<compile_context>
chip_gen: v5e
topology: v5e:2x2
jax: 0.10.0
libtpu: 0.0.40
codegen_flags: <defaults>
</compile_context>

<pallas_src>
import functools

import numpy as np
import jax
import jax.numpy as jnp
from jax.experimental import pallas as pl
from jax.experimental.pallas import tpu as pltpu

KSIZE = 3
EPS = 1e-5


# ----------------------------- fused Pallas kernel ---------------------------------
def _v4_tiny_block_kernel(
    xp_ref,    # (H+2, W*Cin)  f32   H-padded input rows (W pad folded into t1)
    t1_ref,    # (3, W*Cin, W*Cout) bf16  conv1 row-Toeplitz factors (BN scale folded)
    b1_ref,    # (1, W*Cout)   f32   conv1 folded BN bias (tiled per pixel)
    t2_ref,    # (3, W*Cout, W*Cout) bf16
    b2_ref,    # (1, W*Cout)   f32
    w3a_ref,   # (W*Cout, W*2Cout)   bf16  conv3 rows multiplying x2 (= cat[:, :C])
    w3b_ref,   # (W*Cout, W*2Cout)   bf16  conv3 rows multiplying y  (= cat[:, C:])
    b3_ref,    # (1, W*2Cout)  f32
    o_ref,     # (H, W*2Cout)  f32   block output (lane-dense)
    ypad_ref,  # VMEM scratch (H+2, W*Cout) f32: row-shift staging for conv2
):
    hp = xp_ref.shape[0]
    h = hp - (KSIZE - 1)
    wc = ypad_ref.shape[1]
    cdt = t1_ref.dtype          # bf16 MXU operand dtype
    f32 = jnp.float32

    # ---- conv1 (3x3, pad=1) + BN + ReLU --------------------------------------------
    # W-direction taps & padding live inside the (W*Cin, W*Cout) Toeplitz factors; the
    # H direction is handled by three shifted row windows of the H-padded input.
    acc = jnp.dot(xp_ref[0:h, :].astype(cdt), t1_ref[0], preferred_element_type=f32)
    acc += jnp.dot(xp_ref[1:1 + h, :].astype(cdt), t1_ref[1], preferred_element_type=f32)
    acc += jnp.dot(xp_ref[2:2 + h, :].astype(cdt), t1_ref[2], preferred_element_type=f32)
    y = jnp.maximum(acc + b1_ref[...], 0.0)                      # (H, W*C) f32
    y_c = y.astype(cdt)

    # ---- conv2 (3x3, pad=1) + BN + ReLU on y ---------------------------------------
    # Stage y once at row offset 1 so the kh=0/2 windows are plain shifted slices.  The
    # 1-row halo (rows 0 and H+1, never written) is masked out with iota selects, so no
    # scratch initialisation is needed and nothing persists across grid steps.
    ypad_ref[1:1 + h, :] = y
    row = jax.lax.broadcasted_iota(jnp.int32, (h, wc), 0)
    win0 = jnp.where(row == 0, 0.0, ypad_ref[0:h, :]).astype(cdt)          # y rows [-1..H-2]
    win2 = jnp.where(row == h - 1, 0.0, ypad_ref[2:2 + h, :]).astype(cdt)  # y rows [1..H]
    acc = jnp.dot(win0, t2_ref[0], preferred_element_type=f32)
    acc += jnp.dot(y_c, t2_ref[1], preferred_element_type=f32)
    acc += jnp.dot(win2, t2_ref[2], preferred_element_type=f32)
    x2 = jnp.maximum(acc + b2_ref[...], 0.0)                     # (H, W*C) f32

    # ---- conv3 (1x1) + BN + ReLU on concat([x2, y], channel) -------------------------
    # The channel concat never materialises: w3a is the block-diagonal (per pixel) slice
    # of W3 acting on x2, w3b the slice acting on y.
    acc = jnp.dot(x2.astype(cdt), w3a_ref[...], preferred_element_type=f32)
    acc += jnp.dot(y_c, w3b_ref[...], preferred_element_type=f32)
    # (H, W*2C) = (16, 128): fully lane-dense, single unmasked store.
    o_ref[...] = jnp.maximum(acc + b3_ref[...], 0.0).astype(o_ref.dtype)


# ----------------------------- wrapper ---------------------------------------------
@jax.jit
def v4_tiny_block(x_nchw, t1, b1, t2, b2, w3a, w3b, b3):
    """x_nchw: (B, Cin, H, W).  Weights pre-folded (BN scale + W-taps in row-Toeplitz form)."""
    b, cin, h, w = x_nchw.shape
    wcout = b1.shape[1]          # W * Cout
    wc2 = b3.shape[1]            # W * 2*Cout
    hp = h + 2

    # NCHW -> (B, H, W*Cin) with channels fastest in lanes; pad H only (W pad is in t1).
    x2d = jnp.transpose(x_nchw, (0, 2, 3, 1)).reshape(b, h, w * cin)
    xp = jnp.pad(x2d, ((0, 0), (1, 1), (0, 0)))

    out = pl.pallas_call(
        _v4_tiny_block_kernel,
        out_shape=jax.ShapeDtypeStruct((b, h, wc2), jnp.float32),
        grid=(b,),
        in_specs=[
            pl.BlockSpec((None, hp, w * cin), lambda i: (i, 0, 0)),
            pl.BlockSpec(t1.shape, lambda i: (0, 0, 0)),
            pl.BlockSpec(b1.shape, lambda i: (0, 0)),
            pl.BlockSpec(t2.shape, lambda i: (0, 0, 0)),
            pl.BlockSpec(b2.shape, lambda i: (0, 0)),
            pl.BlockSpec(w3a.shape, lambda i: (0, 0)),
            pl.BlockSpec(w3b.shape, lambda i: (0, 0)),
            pl.BlockSpec(b3.shape, lambda i: (0, 0)),
        ],
        out_specs=pl.BlockSpec((None, h, wc2), lambda i: (i, 0, 0)),
        scratch_shapes=[pltpu.VMEM((hp, wcout), jnp.float32)],
        compiler_params=pltpu.CompilerParams(
            dimension_semantics=("parallel",),
            vmem_limit_bytes=32 * 1024 * 1024),
    )(xp, t1, b1, t2, b2, w3a, w3b, b3)

    # (B, H, W*2C) -> NCHW: a one-shot XLA transpose of the tiny (16 KB) dense output.
    c2 = wc2 // w
    return jnp.transpose(out.reshape(b, h, w, c2), (0, 3, 1, 2))


# ----------------------------- parameter folding -----------------------------------
def _init_conv_bn_params(key, cin, cout, ksize):
    """Deterministic synthetic Conv2d+BatchNorm2d parameters (PyTorch layouts)."""
    k_w, k_g, k_b, k_m, k_v = jax.random.split(key, 5)
    w = jax.random.normal(k_w, (cout, cin, ksize, ksize), jnp.float32) * 0.1
    gamma = jax.random.uniform(k_g, (cout,), jnp.float32, 0.5, 1.5)
    beta = jax.random.normal(k_b, (cout,), jnp.float32) * 0.1
    mean = jax.random.normal(k_m, (cout,), jnp.float32) * 0.1
    var = jax.random.uniform(k_v, (cout,), jnp.float32, 0.5, 1.5)
    return dict(w=w, gamma=gamma, beta=beta, mean=mean, var=var)


def _fold_bn(p, eps=EPS):
    scale = p["gamma"] / jnp.sqrt(p["var"] + eps)
    bias = p["beta"] - p["mean"] * scale
    return scale, bias


def _conv3x3_to_row_toeplitz(w_oihw, scale, width):
    """(Cout,Cin,3,3) conv with pad=1 -> (3, width*Cin, width*Cout) row-Toeplitz factors.

    Output pixel (r, wout, co) = sum_kh  lhs_kh[r, :] @ t[kh][:, wout*Cout+co], where
    lhs_kh[r, win*Cin+ci] = x_Hpadded[r+kh, win, ci].  W-direction zero padding is
    realised by the absent (out-of-range win) Toeplitz entries.  BN scale folded in.
    """
    w = np.asarray(w_oihw * scale[:, None, None, None], np.float32)   # (co, ci, kh, kw)
    cout, cin, _, _ = w.shape
    t = np.zeros((KSIZE, width, cin, width, cout), np.float32)
    for wout in range(width):
        for kw in range(KSIZE):
            win = wout + kw - 1
            if 0 <= win < width:
                t[:, win, :, wout, :] = np.transpose(w[:, :, :, kw], (2, 1, 0))  # (kh,ci,co)
    return jnp.asarray(t.reshape(KSIZE, width * cin, width * cout), dtype=jnp.bfloat16)


def _conv1x1_to_blockdiag(m_ic_oc, width):
    """(Cin_part, Cout) 1x1 conv slice -> (width*Cin_part, width*Cout) block-diagonal."""
    m = np.asarray(m_ic_oc, np.float32)
    cinp, cout = m.shape
    a = np.zeros((width, cinp, width, cout), np.float32)
    for w_ in range(width):
        a[w_, :, w_, :] = m
    return jnp.asarray(a.reshape(width * cinp, width * cout), dtype=jnp.bfloat16)


def _tile_bias(bias, width):
    return jnp.tile(bias, width).reshape(1, -1).astype(jnp.float32)


# ----------------------------- pure-JAX reference ----------------------------------
def _ref_cbr(x_nhwc, p, ksize, eps=EPS):
    pad = (ksize - 1) // 2
    w_hwio = jnp.transpose(p["w"], (2, 3, 1, 0))
    y = jax.lax.conv_general_dilated(
        x_nhwc, w_hwio, window_strides=(1, 1),
        padding=[(pad, pad), (pad, pad)],
        dimension_numbers=("NHWC", "HWIO", "NHWC"))
    scale = p["gamma"] / jnp.sqrt(p["var"] + eps)
    bias = p["beta"] - p["mean"] * scale
    return jnp.maximum(y * scale + bias, 0.0)


def _ref_block(x_nchw, p1, p2, p3):
    x = jnp.transpose(x_nchw, (0, 2, 3, 1))
    y = _ref_cbr(x, p1, 3)
    x2 = _ref_cbr(y, p2, 3)
    cat = jnp.concatenate([x2, y], axis=-1)   # torch.cat((x, y), dim=1)
    out = _ref_cbr(cat, p3, 1)
    return jnp.transpose(out, (0, 3, 1, 2))


# ------------------------------------ main ------------------------------------------
if __name__ == "__main__":
    B, CIN, COUT, H, W = 2, 4, 4, 16, 16
    key = jax.random.PRNGKey(0)
    kx, kp = jax.random.split(key)
    x = jax.random.normal(kx, (B, CIN, H, W), jnp.float32)

    k1, k2, k3 = jax.random.split(kp, 3)
    p1 = _init_conv_bn_params(k1, CIN, COUT, 3)
    p2 = _init_conv_bn_params(k2, COUT, COUT, 3)
    p3 = _init_conv_bn_params(k3, 2 * COUT, 2 * COUT, 1)

    s1, bias1 = _fold_bn(p1)
    s2, bias2 = _fold_bn(p2)
    s3, bias3 = _fold_bn(p3)

    t1 = _conv3x3_to_row_toeplitz(p1["w"], s1, W)
    t2 = _conv3x3_to_row_toeplitz(p2["w"], s2, W)
    w3s = np.asarray(p3["w"][:, :, 0, 0] * s3[:, None], np.float32)   # (2C, 2C), [co, j]
    w3a = _conv1x1_to_blockdiag(w3s[:, :COUT].T, W)   # acts on x2 (= cat[:, :C])
    w3b = _conv1x1_to_blockdiag(w3s[:, COUT:].T, W)   # acts on y  (= cat[:, C:])
    b1r = _tile_bias(bias1, W)
    b2r = _tile_bias(bias2, W)
    b3r = _tile_bias(bias3, W)

    out = jax.block_until_ready(v4_tiny_block(x, t1, b1r, t2, b2r, w3a, w3b, b3r))
    assert out.shape == (B, 2 * COUT, H, W), out.shape

    ref = jax.block_until_ready(_ref_block(x, p1, p2, p3))
    max_err = float(jnp.max(jnp.abs(out - ref)))
    # bf16 MXU operands with f32 accumulation -> ~1e-2 relative accuracy is expected.
    assert jnp.allclose(out, ref, rtol=2e-2, atol=5e-2), max_err

    print("KERNEL_OK")
</pallas_src>

<mosaic_0001>
module attributes {stable_mosaic.version = 11 : i64} {
  func.func @_v4_tiny_block_kernel(%arg0: i32, %arg1: memref<1x18x64xf32, #tpu.memory_space<vmem>>, %arg2: memref<3x64x64xbf16, #tpu.memory_space<vmem>>, %arg3: memref<1x64xf32, #tpu.memory_space<vmem>>, %arg4: memref<3x64x64xbf16, #tpu.memory_space<vmem>>, %arg5: memref<1x64xf32, #tpu.memory_space<vmem>>, %arg6: memref<64x128xbf16, #tpu.memory_space<vmem>>, %arg7: memref<64x128xbf16, #tpu.memory_space<vmem>>, %arg8: memref<1x128xf32, #tpu.memory_space<vmem>>, %arg9: memref<1x16x128xf32, #tpu.memory_space<vmem>>, %arg10: memref<18x64xf32, #tpu.memory_space<vmem>>) attributes {dimension_semantics = [#tpu.dimension_semantics<parallel>], iteration_bounds = array<i64: 2>, scalar_prefetch = 0 : i64, scratch_operands = 1 : i64, tpu.core_type = #tpu.core_type<tc>, window_params = [{transform_indices = @transform_0, window_bounds = array<i64: 1, 18, 64>}, {pipeline_mode = #tpu.pipeline_mode<synchronous>, transform_indices = @transform_1, window_bounds = array<i64: 3, 64, 64>}, {pipeline_mode = #tpu.pipeline_mode<synchronous>, transform_indices = @transform_2, window_bounds = array<i64: 1, 64>}, {pipeline_mode = #tpu.pipeline_mode<synchronous>, transform_indices = @transform_3, window_bounds = array<i64: 3, 64, 64>}, {pipeline_mode = #tpu.pipeline_mode<synchronous>, transform_indices = @transform_4, window_bounds = array<i64: 1, 64>}, {pipeline_mode = #tpu.pipeline_mode<synchronous>, transform_indices = @transform_5, window_bounds = array<i64: 64, 128>}, {pipeline_mode = #tpu.pipeline_mode<synchronous>, transform_indices = @transform_6, window_bounds = array<i64: 64, 128>}, {pipeline_mode = #tpu.pipeline_mode<synchronous>, transform_indices = @transform_7, window_bounds = array<i64: 1, 128>}, {transform_indices = @transform_8, window_bounds = array<i64: 1, 16, 128>}]} {
    %c0 = arith.constant 0 : index
    %c0_0 = arith.constant 0 : index
    %c0_1 = arith.constant 0 : index
    %0 = vector.load %arg1[%c0, %c0_0, %c0_1] : memref<1x18x64xf32, #tpu.memory_space<vmem>>, vector<1x16x64xf32>
    %1 = vector.shape_cast %0 : vector<1x16x64xf32> to vector<16x64xf32>
    %2 = arith.truncf %1 : vector<16x64xf32> to vector<16x64xbf16>
    %c0_2 = arith.constant 0 : index
    %c0_3 = arith.constant 0 : index
    %c0_4 = arith.constant 0 : index
    %3 = vector.load %arg2[%c0_2, %c0_3, %c0_4] : memref<3x64x64xbf16, #tpu.memory_space<vmem>>, vector<1x64x64xbf16>
    %4 = vector.shape_cast %3 : vector<1x64x64xbf16> to vector<64x64xbf16>
    %cst = arith.constant dense<0.000000e+00> : vector<16x64xf32>
    %5 = tpu.matmul %2, %4, %cst {dimension_numbers = #tpu.dot_dimension_numbers<[1], [0], [0], [1], [0, 0, 1, 1], [], []>} : vector<16x64xbf16>, vector<64x64xbf16>, vector<16x64xf32> -> vector<16x64xf32>
    %c0_5 = arith.constant 0 : index
    %c1 = arith.constant 1 : index
    %c0_6 = arith.constant 0 : index
    %6 = vector.load %arg1[%c0_5, %c1, %c0_6] : memref<1x18x64xf32, #tpu.memory_space<vmem>>, vector<1x16x64xf32>
    %7 = vector.shape_cast %6 : vector<1x16x64xf32> to vector<16x64xf32>
    %8 = arith.truncf %7 : vector<16x64xf32> to vector<16x64xbf16>
    %c1_7 = arith.constant 1 : index
    %c0_8 = arith.constant 0 : index
    %c0_9 = arith.constant 0 : index
    %9 = vector.load %arg2[%c1_7, %c0_8, %c0_9] : memref<3x64x64xbf16, #tpu.memory_space<vmem>>, vector<1x64x64xbf16>
    %10 = vector.shape_cast %9 : vector<1x64x64xbf16> to vector<64x64xbf16>
    %cst_10 = arith.constant dense<0.000000e+00> : vector<16x64xf32>
    %11 = tpu.matmul %8, %10, %cst_10 {dimension_numbers = #tpu.dot_dimension_numbers<[1], [0], [0], [1], [0, 0, 1, 1], [], []>} : vector<16x64xbf16>, vector<64x64xbf16>, vector<16x64xf32> -> vector<16x64xf32>
    %12 = arith.addf %5, %11 : vector<16x64xf32>
    %c0_11 = arith.constant 0 : index
    %c2 = arith.constant 2 : index
    %c0_12 = arith.constant 0 : index
    %13 = vector.load %arg1[%c0_11, %c2, %c0_12] : memref<1x18x64xf32, #tpu.memory_space<vmem>>, vector<1x16x64xf32>
    %14 = vector.shape_cast %13 : vector<1x16x64xf32> to vector<16x64xf32>
    %15 = arith.truncf %14 : vector<16x64xf32> to vector<16x64xbf16>
    %c2_13 = arith.constant 2 : index
    %c0_14 = arith.constant 0 : index
    %c0_15 = arith.constant 0 : index
    %16 = vector.load %arg2[%c2_13, %c0_14, %c0_15] : memref<3x64x64xbf16, #tpu.memory_space<vmem>>, vector<1x64x64xbf16>
    %17 = vector.shape_cast %16 : vector<1x64x64xbf16> to vector<64x64xbf16>
    %cst_16 = arith.constant dense<0.000000e+00> : vector<16x64xf32>
    %18 = tpu.matmul %15, %17, %cst_16 {dimension_numbers = #tpu.dot_dimension_numbers<[1], [0], [0], [1], [0, 0, 1, 1], [], []>} : vector<16x64xbf16>, vector<64x64xbf16>, vector<16x64xf32> -> vector<16x64xf32>
    %19 = arith.addf %12, %18 : vector<16x64xf32>
    %c0_17 = arith.constant 0 : index
    %c0_18 = arith.constant 0 : index
    %20 = vector.load %arg3[%c0_17, %c0_18] : memref<1x64xf32, #tpu.memory_space<vmem>>, vector<1x64xf32>
    %21 = vector.broadcast %20 : vector<1x64xf32> to vector<16x64xf32>
    %22 = arith.addf %19, %21 : vector<16x64xf32>
    %cst_19 = arith.constant 0.000000e+00 : f32
    %23 = vector.broadcast %cst_19 : f32 to vector<16x64xf32>
    %24 = arith.maximumf %22, %23 : vector<16x64xf32>
    %25 = arith.truncf %24 : vector<16x64xf32> to vector<16x64xbf16>
    %c1_20 = arith.constant 1 : index
    %c0_21 = arith.constant 0 : index
    %26 = vector.load %arg10[%c1_20, %c0_21] : memref<18x64xf32, #tpu.memory_space<vmem>>, vector<16x64xf32>
    tpu.vector_store %arg10[%c1_20, %c0_21], %24 {strides = array<i32>} : memref<18x64xf32, #tpu.memory_space<vmem>>, vector<16x64xf32>,
    %27 = tpu.iota {dimensions = array<i32: 0>} : vector<16x64xi32>
    %c0_i32 = arith.constant 0 : i32
    %28 = vector.broadcast %c0_i32 : i32 to vector<16x64xi32>
    %29 = arith.cmpi eq, %27, %28 : vector<16x64xi32>
    %c0_22 = arith.constant 0 : index
    %c0_23 = arith.constant 0 : index
    %30 = vector.load %arg10[%c0_22, %c0_23] : memref<18x64xf32, #tpu.memory_space<vmem>>, vector<16x64xf32>
    %cst_24 = arith.constant 0.000000e+00 : f32
    %31 = vector.broadcast %cst_24 : f32 to vector<16x64xf32>
    %32 = arith.select %29, %31, %30 : vector<16x64xi1>, vector<16x64xf32>
    %33 = arith.truncf %32 : vector<16x64xf32> to vector<16x64xbf16>
    %c15_i32 = arith.constant 15 : i32
    %34 = vector.broadcast %c15_i32 : i32 to vector<16x64xi32>
    %35 = arith.cmpi eq, %27, %34 : vector<16x64xi32>
    %c2_25 = arith.constant 2 : index
    %c0_26 = arith.constant 0 : index
    %36 = vector.load %arg10[%c2_25, %c0_26] : memref<18x64xf32, #tpu.memory_space<vmem>>, vector<16x64xf32>
    %cst_27 = arith.constant 0.000000e+00 : f32
    %37 = vector.broadcast %cst_27 : f32 to vector<16x64xf32>
    %38 = arith.select %35, %37, %36 : vector<16x64xi1>, vector<16x64xf32>
    %39 = arith.truncf %38 : vector<16x64xf32> to vector<16x64xbf16>
    %c0_28 = arith.constant 0 : index
    %c0_29 = arith.constant 0 : index
    %c0_30 = arith.constant 0 : index
    %40 = vector.load %arg4[%c0_28, %c0_29, %c0_30] : memref<3x64x64xbf16, #tpu.memory_space<vmem>>, vector<1x64x64xbf16>
    %41 = vector.shape_cast %40 : vector<1x64x64xbf16> to vector<64x64xbf16>
    %cst_31 = arith.constant dense<0.000000e+00> : vector<16x64xf32>
    %42 = tpu.matmul %33, %41, %cst_31 {dimension_numbers = #tpu.dot_dimension_numbers<[1], [0], [0], [1], [0, 0, 1, 1], [], []>} : vector<16x64xbf16>, vector<64x64xbf16>, vector<16x64xf32> -> vector<16x64xf32>
    %c1_32 = arith.constant 1 : index
    %c0_33 = arith.constant 0 : index
    %c0_34 = arith.constant 0 : index
    %43 = vector.load %arg4[%c1_32, %c0_33, %c0_34] : memref<3x64x64xbf16, #tpu.memory_space<vmem>>, vector<1x64x64xbf16>
    %44 = vector.shape_cast %43 : vector<1x64x64xbf16> to vector<64x64xbf16>
    %cst_35 = arith.constant dense<0.000000e+00> : vector<16x64xf32>
    %45 = tpu.matmul %25, %44, %cst_35 {dimension_numbers = #tpu.dot_dimension_numbers<[1], [0], [0], [1], [0, 0, 1, 1], [], []>} : vector<16x64xbf16>, vector<64x64xbf16>, vector<16x64xf32> -> vector<16x64xf32>
    %46 = arith.addf %42, %45 : vector<16x64xf32>
    %c2_36 = arith.constant 2 : index
    %c0_37 = arith.constant 0 : index
    %c0_38 = arith.constant 0 : index
    %47 = vector.load %arg4[%c2_36, %c0_37, %c0_38] : memref<3x64x64xbf16, #tpu.memory_space<vmem>>, vector<1x64x64xbf16>
    %48 = vector.shape_cast %47 : vector<1x64x64xbf16> to vector<64x64xbf16>
    %cst_39 = arith.constant dense<0.000000e+00> : vector<16x64xf32>
    %49 = tpu.matmul %39, %48, %cst_39 {dimension_numbers = #tpu.dot_dimension_numbers<[1], [0], [0], [1], [0, 0, 1, 1], [], []>} : vector<16x64xbf16>, vector<64x64xbf16>, vector<16x64xf32> -> vector<16x64xf32>
    %50 = arith.addf %46, %49 : vector<16x64xf32>
    %c0_40 = arith.constant 0 : index
    %c0_41 = arith.constant 0 : index
    %51 = vector.load %arg5[%c0_40, %c0_41] : memref<1x64xf32, #tpu.memory_space<vmem>>, vector<1x64xf32>
    %52 = vector.broadcast %51 : vector<1x64xf32> to vector<16x64xf32>
    %53 = arith.addf %50, %52 : vector<16x64xf32>
    %cst_42 = arith.constant 0.000000e+00 : f32
    %54 = vector.broadcast %cst_42 : f32 to vector<16x64xf32>
    %55 = arith.maximumf %53, %54 : vector<16x64xf32>
    %56 = arith.truncf %55 : vector<16x64xf32> to vector<16x64xbf16>
    %c0_43 = arith.constant 0 : index
    %c0_44 = arith.constant 0 : index
    %57 = vector.load %arg6[%c0_43, %c0_44] : memref<64x128xbf16, #tpu.memory_space<vmem>>, vector<64x128xbf16>
    %cst_45 = arith.constant dense<0.000000e+00> : vector<16x128xf32>
    %58 = tpu.matmul %56, %57, %cst_45 {dimension_numbers = #tpu.dot_dimension_numbers<[1], [0], [0], [1], [0, 0, 1, 1], [], []>} : vector<16x64xbf16>, vector<64x128xbf16>, vector<16x128xf32> -> vector<16x128xf32>
    %c0_46 = arith.constant 0 : index
    %c0_47 = arith.constant 0 : index
    %59 = vector.load %arg7[%c0_46, %c0_47] : memref<64x128xbf16, #tpu.memory_space<vmem>>, vector<64x128xbf16>
    %cst_48 = arith.constant dense<0.000000e+00> : vector<16x128xf32>
    %60 = tpu.matmul %25, %59, %cst_48 {dimension_numbers = #tpu.dot_dimension_numbers<[1], [0], [0], [1], [0, 0, 1, 1], [], []>} : vector<16x64xbf16>, vector<64x128xbf16>, vector<16x128xf32> -> vector<16x128xf32>
    %61 = arith.addf %58, %60 : vector<16x128xf32>
    %c0_49 = arith.constant 0 : index
    %c0_50 = arith.constant 0 : index
    %62 = vector.load %arg8[%c0_49, %c0_50] : memref<1x128xf32, #tpu.memory_space<vmem>>, vector<1x128xf32>
    %63 = vector.broadcast %62 : vector<1x128xf32> to vector<16x128xf32>
    %64 = arith.addf %61, %63 : vector<16x128xf32>
    %cst_51 = arith.constant 0.000000e+00 : f32
    %65 = vector.broadcast %cst_51 : f32 to vector<16x128xf32>
    %66 = arith.maximumf %64, %65 : vector<16x128xf32>
    %c0_52 = arith.constant 0 : index
    %c0_53 = arith.constant 0 : index
    %c0_54 = arith.constant 0 : index
    %67 = vector.load %arg9[%c0_52, %c0_53, %c0_54] : memref<1x16x128xf32, #tpu.memory_space<vmem>>, vector<1x16x128xf32>
    %68 = vector.shape_cast %67 : vector<1x16x128xf32> to vector<16x128xf32>
    %69 = vector.shape_cast %66 : vector<16x128xf32> to vector<1x16x128xf32>
    tpu.vector_store %arg9[%c0_52, %c0_53, %c0_54], %69 {strides = array<i32>} : memref<1x16x128xf32, #tpu.memory_space<vmem>>, vector<1x16x128xf32>,
    return
  }
  func.func @transform_0(%arg0: i32) -> (i32, i32, i32) {
    %c0_i32 = arith.constant 0 : i32
    %c0_i32_0 = arith.constant 0 : i32
    %c0_i32_1 = arith.constant 0 : i32
    return %arg0, %c0_i32, %c0_i32_0 : i32, i32, i32
  }
  func.func @transform_1(%arg0: i32) -> (i32, i32, i32) {
    %c0_i32 = arith.constant 0 : i32
    %c0_i32_0 = arith.constant 0 : i32
    %c0_i32_1 = arith.constant 0 : i32
    %c0_i32_2 = arith.constant 0 : i32
    return %c0_i32, %c0_i32_0, %c0_i32_1 : i32, i32, i32
  }
  func.func @transform_2(%arg0: i32) -> (i32, i32) {
    %c0_i32 = arith.constant 0 : i32
    %c0_i32_0 = arith.constant 0 : i32
    %c0_i32_1 = arith.constant 0 : i32
    return %c0_i32, %c0_i32_0 : i32, i32
  }
  func.func @transform_3(%arg0: i32) -> (i32, i32, i32) {
    %c0_i32 = arith.constant 0 : i32
    %c0_i32_0 = arith.constant 0 : i32
    %c0_i32_1 = arith.constant 0 : i32
    %c0_i32_2 = arith.constant 0 : i32
    return %c0_i32, %c0_i32_0, %c0_i32_1 : i32, i32, i32
  }
  func.func @transform_4(%arg0: i32) -> (i32, i32) {
    %c0_i32 = arith.constant 0 : i32
    %c0_i32_0 = arith.constant 0 : i32
    %c0_i32_1 = arith.constant 0 : i32
    return %c0_i32, %c0_i32_0 : i32, i32
  }
  func.func @transform_5(%arg0: i32) -> (i32, i32) {
    %c0_i32 = arith.constant 0 : i32
    %c0_i32_0 = arith.constant 0 : i32
    %c0_i32_1 = arith.constant 0 : i32
    return %c0_i32, %c0_i32_0 : i32, i32
  }
  func.func @transform_6(%arg0: i32) -> (i32, i32) {
    %c0_i32 = arith.constant 0 : i32
    %c0_i32_0 = arith.constant 0 : i32
    %c0_i32_1 = arith.constant 0 : i32
    return %c0_i32, %c0_i32_0 : i32, i32
  }
  func.func @transform_7(%arg0: i32) -> (i32, i32) {
    %c0_i32 = arith.constant 0 : i32
    %c0_i32_0 = arith.constant 0 : i32
    %c0_i32_1 = arith.constant 0 : i32
    return %c0_i32, %c0_i32_0 : i32, i32
  }
  func.func @transform_8(%arg0: i32) -> (i32, i32, i32) {
    %c0_i32 = arith.constant 0 : i32
    %c0_i32_0 = arith.constant 0 : i32
    %c0_i32_1 = arith.constant 0 : i32
    return %arg0, %c0_i32, %c0_i32_0 : i32, i32, i32
  }
}

</mosaic_0001>

<bundles_post_ra>
// kernel: v4_tiny_block.1
= control target key start
LH: loop header
LB: loop body
LE: loop exit
PB: predicated region body
PF: predicated region fallthrough
CT: control target
= control target key end

     0   :  { %s1093_s27 = smov 0   ;;  %s1229_s0 = inlined_call_operand.vmem [shape: f32[2,18,64], index: 0, kind: input, shape index: {}]   ;;  %s1230_s1 = inlined_call_operand.vmem [shape: bf16[3,64,64], index: 1, kind: input, shape index: {}]   ;;  %s1231_s2 = inlined_call_operand.vmem [shape: f32[1,64], index: 2, kind: input, shape index: {}]   ;;  %s1232_s3 = inlined_call_operand.vmem [shape: bf16[3,64,64], index: 3, kind: input, shape index: {}]   ;;  %s1233_s4 = inlined_call_operand.vmem [shape: f32[1,64], index: 4, kind: input, shape index: {}]   ;;  %s1234_s5 = inlined_call_operand.vmem [shape: bf16[64,128], index: 5, kind: input, shape index: {}]   ;;  %s1235_s6 = inlined_call_operand.vmem [shape: bf16[64,128], index: 6, kind: input, shape index: {}]   ;;  %s1236_s7 = inlined_call_operand.vmem [shape: f32[1,128], index: 7, kind: input, shape index: {}]   ;;  %s1237_s8 = inlined_call_operand.vmem [shape: f32[2,16,128], index: 8, kind: output, shape index: {}]  }
   0x1 LB: > { %s816_s28 = sadd.s32 4294967295, %s1046_s27   ;;  %p820_p0 = scmp.ge.s32.totalorder %s1046_s27, 1  ;;  %s1046_s27 = sphi %s1093_s27, %s18_s27  }
   0x2   : > { %p262_p1 = scmp.lt.s32.totalorder %s1046_s27, 3 }
   0x4   : > { %p263_p2 = pnand %p820_p0, %p262_p1 }
   0x5   : > { %p296_p3 = scmp.lt.s32.totalorder (!%p263_p2), %s816_s28, 1 }
   0x6   : > { %266 = sbr.rel (%p263_p2) target bundleno = 476 (0x1dc), region = 52 }
   0xb   : > { %v1003_v0 = vld [vmem:[%s1230_s1 + $0x38] sm:$0xff]  ;;  %v1002_v3 = vld [vmem:[%s1230_s1 + $0x30] sm:$0xff]  ;;  %s1239_s28 = smov (!%p296_p3, %s816_s28), 1  ;;  %v1001_v6 = vld [vmem:[%s1230_s1 + $0x28] sm:$0xff]  ;;  %vm354_vm0 = vcmask 523264   ;;  %v479_v49 = vlaneseq }
   0xc   : > { %v999_v1 = vld [vmem:[%s1230_s1 + $0x18] sm:$0xff]  ;;  %362 = vmatpush.bf16.msra.mxu0 %v1003_v0  ;;  %v998_v4 = vld [vmem:[%s1230_s1 + $0x10] sm:$0xff]  ;;  %s1028_s19 = smul.u32 24, %s1239_s28  ;;  %v997_v7 = vld [vmem:[%s1230_s1 + $0x8] sm:$0xff]  ;;  %s995_s21 = sshll.u32 %s1239_s28, 4 }
   0xd   : > { %v1007_v2 = vld [vmem:[%s1230_s1 + $0x58] sm:$0xff]  ;;  %403 = vmatpush.bf16.msra.mxu1 %v999_v1  ;;  %v1006_v5 = vld [vmem:[%s1230_s1 + $0x50] sm:$0xff]  ;;  %v1005_v8 = vld [vmem:[%s1230_s1 + $0x48] sm:$0xff]  ;;  %v480_v52 = vshrl.u32 %v479_v49, 7  ;;  %s305_s24 = scalar_lea.vmem %s1237_s8, %s995_s21 }
   0xe   : > { %456 = vmatpush.bf16.msra.mxu2 %v1007_v2  ;;  %s300_s26 = scalar_lea.vmem %s1229_s0, %s1028_s19  ;;  %v1000_v9 = vld [vmem:[%s1230_s1 + $0x20] sm:$0xff]  ;;  %v1015_v21 = vld [vmem:[%s1232_s3 + $0x38] sm:$0xff]  ;;  %v1014_v23 = vld [vmem:[%s1232_s3 + $0x30] sm:$0xff] }
   0xf   : > { %v996_v10 = vld [vmem:[%s1230_s1] sm:$0xff]  ;;  %v319_v12 = vld [vmem:[%s300_s26 + $0x9] sm:$0xff]  ;;  %v1027_v22 = vld [vmem:[%s1235_s6 + $0x18] sm:$0xff]  ;;  %544 = vmatpush.bf16.msra.mxu3 %v1015_v21  ;;  %v481_v55 = vadd.s32 8, %v480_v52 }
  0x10   : > { %363 = vmatpush.bf16.msra.mxu0 %v1002_v3  ;;  %v318_v11 = vld [vmem:[%s300_s26 + $0x1] sm:$0xff]  ;;  %v414_v17 = vld [vmem:[%s300_s26 + $0xa] sm:$0xff]  ;;  %v1011_v25 = vld [vmem:[%s1232_s3 + $0x18] sm:$0xff] }
  0x11   : > { %404 = vmatpush.bf16.msra.mxu1 %v998_v4  ;;  %v307_v13 = vld [vmem:[%s300_s26] sm:$0xff]  ;;  %v308_v14 = vld [vmem:[%s300_s26 + $0x8] sm:$0xff]  ;;  %v320_v18 = vpack.c.bf16 %v319_v12, %v318_v11  ;;  %v1026_v24 = vld [vmem:[%s1235_s6 + $0x10] sm:$0xff]  ;;  %vm490_vm1 = vcmp.eq.s32.totalorder %v481_v55, 15 }
  0x12   : > { %457 = vmatpush.bf16.msra.mxu2 %v1006_v5  ;;  %v1004_v15 = vld [vmem:[%s1230_s1 + $0x40] sm:$0xff]  ;;  %v309_v19 = vpack.c.bf16 %v308_v14, %v307_v13  ;;  %v1013_v26 = vld [vmem:[%s1232_s3 + $0x28] sm:$0xff]  ;;  %v1019_v28 = vld [vmem:[%s1232_s3 + $0x58] sm:$0xff] }
  0x13   : > { %v413_v16 = vld [vmem:[%s300_s26 + $0x2] sm:$0xff]  ;;  %545 = vmatpush.bf16.msra.mxu3 %v1014_v23  ;;  %v1010_v29 = vld [vmem:[%s1232_s3 + $0x10] sm:$0xff]  ;;  %v1037_v40 = vld [vmem:[%s1231_s2] ss:$0 sm:$0xff] }
  0x14   : > { %364 = vmatpush.bf16.msra.mxu0 %v1001_v6  ;;  %v415_v20 = vpack.c.bf16 %v414_v17, %v413_v16  ;;  %v1025_v27 = vld [vmem:[%s1235_s6 + $0x8] sm:$0xff]  ;;  %v1012_v30 = vld [vmem:[%s1232_s3 + $0x20] sm:$0xff]  ;;  %v1018_v32 = vld [vmem:[%s1232_s3 + $0x50] sm:$0xff] }
  0x15   : > { %405 = vmatpush.bf16.msra.mxu1 %v997_v7  ;;  %v1024_v31 = vld [vmem:[%s1235_s6] sm:$0xff]  ;;  %v1009_v33 = vld [vmem:[%s1232_s3 + $0x8] sm:$0xff]  ;;  %v1023_v63 = vld [vmem:[%s1234_s5 + $0x18] sm:$0xff] }
  0x16   : > { %458 = vmatpush.bf16.msra.mxu2 %v1005_v8  ;;  %v1017_v34 = vld [vmem:[%s1232_s3 + $0x48] sm:$0xff]  ;;  %v1008_v35 = vld [vmem:[%s1232_s3] sm:$0xff]  ;;  %v1022_v0 = vld [vmem:[%s1234_s5 + $0x10] sm:$0xff] }
  0x17   : > { %546 = vmatpush.bf16.msra.mxu3 %v1013_v26  ;;  %v1016_v36 = vld [vmem:[%s1232_s3 + $0x40] sm:$0xff]  ;;  %v1021_v1 = vld [vmem:[%s1234_s5 + $0x8] sm:$0xff] }
  0x18   : > { %365 = vmatpush.bf16.msra.mxu0 %v1000_v9  ;;  %v1020_v2 = vld [vmem:[%s1234_s5] sm:$0xff] }
  0x19   : > { %406 = vmatpush.bf16.msra.mxu1 %v996_v10  ;;  %v1038_v8 = vld [vmem:[%s1233_s4] ss:$0 sm:$0xff] }
  0x1a   : > { %459 = vmatpush.bf16.msra.mxu2 %v1004_v15 }
  0x1b   : > { %848 = vmatmul.msk.bf16.vlgmr.msra.gmra.mxu0 %vm354_vm0, %v320_v18  ;;  %547 = vmatpush.bf16.msra.mxu3 %v1012_v30 }
  0x1c   : > { %865 = vmatmul.msk.bf16.vlgmr.msra.gmra.mxu1 %vm354_vm0, %v309_v19  ;;  %585 = vmatpush.bf16.msrb.mxu0 %v1011_v25 }
  0x1d   : > { %890 = vmatmul.msk.bf16.vlgmr.msra.gmra.mxu2 %vm354_vm0, %v415_v20  ;;  %635 = vmatpush.bf16.msrb.mxu1 %v1019_v28  ;;  %v1039_v20 = vld [vmem:[%s1236_s7] ss:$0 sm:$0xff] }
  0x1e   : > { %700 = vmatpush.bf16.msrb.mxu2 %v1027_v22 }
  0x1f   : > { %741 = vmatpush.bf16.msrb.mxu3 %v1023_v63 }
  0x20   : > { %586 = vmatpush.bf16.msrb.mxu0 %v1010_v29 }
  0x21   : > { %636 = vmatpush.bf16.msrb.mxu1 %v1018_v32 }
  0x22   : > { %701 = vmatpush.bf16.msrb.mxu2 %v1026_v24 }
  0x23   : > { %742 = vmatpush.bf16.msrb.mxu3 %v1022_v0 }
  0x24   : > { %587 = vmatpush.bf16.msrb.mxu0 %v1009_v33 }
  0x25   : > { %637 = vmatpush.bf16.msrb.mxu1 %v1017_v34 }
  0x26   : > { %702 = vmatpush.bf16.msrb.mxu2 %v1025_v27 }
  0x27   : > { %743 = vmatpush.bf16.msrb.mxu3 %v1021_v1 }
  0x28   : > { %588 = vmatpush.bf16.msrb.mxu0 %v1008_v35 }
  0x29   : > { %638 = vmatpush.bf16.msrb.mxu1 %v1016_v36 }
  0x2a   : > { %703 = vmatpush.bf16.msrb.mxu2 %v1024_v31 }
  0x2b   : > { %744 = vmatpush.bf16.msrb.mxu3 %v1020_v2 }
  0x98   : > { %v367_v37 = vpop.f32.mrf.mxu0 }
  0x99   : > { %v408_v38 = vpop.f32.mrf.mxu1 }
  0x9a   : > { %v409_v39 = vadd.f32 %v408_v38, %v367_v37 }
  0xa0   : > { %v461_v41 = vpop.f32.mrf.mxu2  ;;  %v369_v44 = vpop.f32.mrf.mxu0 }
  0xa1   : > { %v466_v42 = vadd.f32 %v461_v41, %v409_v39  ;;  %v410_v45 = vpop.f32.mrf.mxu1 }
  0xa2   : > { %v411_v47 = vadd.f32 %v410_v45, %v369_v44 }
  0xa3   : > { %v472_v43 = vadd.f32 %v1037_v40, %v466_v42 }
  0xa5   : > { %v474_v46 = vmax.f32 %v472_v43, 0.0 }
  0xa7   : > { %477 = vst.msk [vmem:[#allocation2 + $0x1] sm:$0xff] %vm354_vm0, %v474_v46 }
  0xa8   : > { %v463_v48 = vpop.f32.mrf.mxu2 }
  0xa9   : > { %v467_v50 = vadd.f32 %v463_v48, %v411_v47 }
  0xab   : > { %v473_v51 = vadd.f32 %v1037_v40, %v467_v50 }
  0xad   : > { %v475_v53 = vmax.f32 %v473_v51, 0.0 }
  0xae   : > { %v891_v56 = vld [vmem:[#allocation2] sm:$0xfe] }
  0xaf   : > { %478 = vst.msk [vmem:[#allocation2 + $0x9] sm:$0xff] %vm354_vm0, %v475_v53  ;;  %v476_v54 = vpack.c.bf16 %v475_v53, %v474_v46 }
  0xb1   : > { %916 = vmatmul.msk.bf16.vlgmr.msra.gmra.mxu3 %vm354_vm0, %v476_v54  ;;  %975 = vmatmul.msk.bf16.vlgmr.msrb.gmra.mxu2 %vm354_vm0, %v476_v54 }
  0xb6   : > { %v485_v57 = vld [vmem:[#allocation2 + $0x8] sm:$0xff] }
  0xb7   : > { %v491_v58 = vld [vmem:[#allocation2 + $0x2] sm:$0xff]  ;;  %v492_v59 = vld [vmem:[#allocation2 + $0xa] sm:$0xff]  ;;  %v488_v60 = vpack.c.bf16 %v485_v57, %v891_v56 }
  0xb8   : > { %v494_v61 = vsel %vm490_vm1, 0.0, %v492_v59 }
  0xb9   : > { %v495_v62 = vpack.c.bf16 %v494_v61, %v491_v58  ;;  %933 = vmatmul.msk.bf16.vlgmr.msrb.gmra.mxu0 %vm354_vm0, %v488_v60 }
  0xbb   : > { %958 = vmatmul.msk.bf16.vlgmr.msrb.gmra.mxu1 %vm354_vm0, %v495_v62 }
 0x134   : > { %v549_v3 = vpop.f32.mrf.mxu3  ;;  %v705_v19 = vpop.f32.mrf.mxu2 }
 0x136   : > { %v590_v4 = vpop.f32.mrf.mxu0 }
 0x137   : > { %v591_v6 = vadd.f32 %v590_v4, %v549_v3 }
 0x138   : > { %v640_v5 = vpop.f32.mrf.mxu1 }
 0x139   : > { %v645_v7 = vadd.f32 %v640_v5, %v591_v6 }
 0x13b   : > { %v651_v13 = vadd.f32 %v1038_v8, %v645_v7 }
 0x13c   : > { %v551_v9 = vpop.f32.mrf.mxu3  ;;  %v707_v25 = vpop.f32.mrf.mxu2 }
 0x13d   : > { %v653_v16 = vmax.f32 %v651_v13, 0.0 }
 0x13e   : > { %v592_v10 = vpop.f32.mrf.mxu0 }
 0x13f   : > { %v593_v11 = vadd.f32 %v592_v10, %v551_v9 }
 0x140   : > { %v642_v12 = vpop.f32.mrf.mxu1 }
 0x141   : > { %v646_v14 = vadd.f32 %v642_v12, %v593_v11 }
 0x143   : > { %v652_v15 = vadd.f32 %v1038_v8, %v646_v14 }
 0x145   : > { %v654_v17 = vmax.f32 %v652_v15, 0.0 }
 0x147   : > { %v655_v18 = vpack.c.bf16 %v654_v17, %v653_v16 }
 0x149   : > { %992 = vmatmul.msk.bf16.vlgmr.msrb.gmra.mxu3 %vm354_vm0, %v655_v18 }
 0x1cc   : > { %v746_v21 = vpop.f32.mrf.mxu3 }
 0x1cd   : > { %v747_v22 = vadd.f32 %v746_v21, %v705_v19 }
 0x1cf   : > { %v755_v23 = vadd.f32 %v1039_v20, %v747_v22 }
 0x1d1   : > { %v757_v24 = vmax.f32 %v755_v23, 0.0 }
 0x1d3   : > { %759 = vst [vmem:[%s305_s24] sm:$0xff] %v757_v24 }
 0x1d4   : > { %v748_v26 = vpop.f32.mrf.mxu3 }
 0x1d5   : > { %v749_v27 = vadd.f32 %v748_v26, %v707_v25 }
 0x1d7   : > { %v756_v28 = vadd.f32 %v1039_v20, %v749_v27 }
 0x1d9   : > { %v758_v29 = vmax.f32 %v756_v28, 0.0 }
 0x1db   : > { %760 = vst [vmem:[%s305_s24 + $0x8] sm:$0xff] %v758_v29 }
 0x1dc PF: > { %s18_s27 = sadd.s32 1, %s1046_s27  }
 0x1dd   : > { %p15_p4 = scmp.ge.s32.totalorder %s18_s27, 4  }
 0x1df   :  { %17 = sbr.rel (!%p15_p4) target bundleno = 1 (0x1), region = 86 }

</bundles_post_ra>
